<compile_context>
chip_gen: v7x
topology: tpu7x:2x2x1
jax: 0.10.0
libtpu: 0.0.40
codegen_flags: <defaults>
</compile_context>

<pallas_src>
import jax
import jax.numpy as jnp
from jax.experimental import pallas as pl
from jax.experimental.pallas import tpu as pltpu


def _round_up(x, m):
    return (x + m - 1) // m * m


def _largest_divisor_tile(desired, total, step=128):
    """Largest multiple of `step` that is <= desired and divides `total`."""
    t = min(desired, total)
    t = max(step, (t // step) * step)
    while total % t:
        t -= step
    return t


# --------------------------------------------------------------------------
# Kernel
# --------------------------------------------------------------------------
def _mlp_kernel(x_ref, w1_ref, b1_ref, w2_ref, b2_ref, o_ref, acc_ref):
    k = pl.program_id(1)

    @pl.when(k == 0)
    def _():
        acc_ref[...] = jnp.zeros_like(acc_ref)

    # First linear, hidden chunk k: [tm, n_pad] @ [n_pad, th] -> f32.
    h = jnp.dot(x_ref[...], w1_ref[...], preferred_element_type=jnp.float32)
    # Bias add + ReLU in f32 (v5e has no bf16 VALU), single down-cast for the
    # second MXU matmul.
    h = jnp.maximum(h + b1_ref[...], 0.0).astype(w2_ref.dtype)
    # Second linear partial sum: [tm, th] @ [th, n_pad], accumulated in f32.
    acc_ref[...] += jnp.dot(h, w2_ref[...], preferred_element_type=jnp.float32)

    @pl.when(k == pl.num_programs(1) - 1)
    def _():
        # TODO(synk): nn.Dropout(p=0.1) training-mode stochastic masking is not
        # reproduced (cannot bit-match torch RNG); eval-mode dropout == identity.
        o_ref[...] = (acc_ref[...] + b2_ref[...]).astype(o_ref.dtype)


# --------------------------------------------------------------------------
# Host-side helpers
# --------------------------------------------------------------------------
def _chip_config():
    """Per-chip tile defaults, VMEM capacity and core count (safe fallbacks)."""
    vmem_cap = 64 << 20  # assume the smallest (v7x per-TC) if detection fails
    try:
        info = pltpu.get_tpu_info()
        vmem_cap = int(getattr(info, "vmem_capacity_bytes", vmem_cap))
    except Exception:
        pass
    kind = ""
    try:
        kind = jax.devices()[0].device_kind.lower()
    except Exception:
        pass
    if "v7" in kind or "7x" in kind:
        tm, th, cores = 512, 256, 2      # fit 64 MiB VMEM, feed both TCs
    elif "v6" in kind:
        tm, th, cores = 1024, 512, 1     # ~650 FLOPs/byte roofline -> tall tile
    elif "v5" in kind:
        tm, th, cores = 256, 512, 1      # ~240 FLOPs/byte roofline, 4x128^2 MXU
    else:
        tm, th, cores = (512, 256, 2) if vmem_cap <= (64 << 20) else (512, 512, 1)
    return tm, th, vmem_cap, cores


def _vmem_bytes(tm, th, n_pad, out_itemsize):
    return int(
        2 * tm * n_pad * 2                # x tile, bf16, double-buffered
        + 2 * n_pad * th * 2              # W1 chunk, bf16, double-buffered
        + 2 * th * n_pad * 2              # W2 chunk, bf16, double-buffered
        + 2 * th * 4 + 2 * n_pad * 4      # bias chunks, f32
        + 2 * tm * n_pad * out_itemsize   # output tile, double-buffered
        + tm * n_pad * 4                  # f32 accumulator scratch
    )


def prepare_mlp_params(w1, b1, w2, b2):
    """One-time zero-pad (to lane-dense multiples of 128) + bf16 cast.

    Doing this per forward call would re-read and re-write both weight
    matrices in HBM on every call, which for a weight-streaming-bound MLP can
    cost as much as the kernel itself.
    """
    n_embd, hidden = w1.shape
    n_pad = _round_up(n_embd, 128)
    hidden_pad = _round_up(hidden, 128)
    w1p = jnp.zeros((n_pad, hidden_pad), jnp.bfloat16).at[:n_embd, :hidden].set(
        w1.astype(jnp.bfloat16))
    w2p = jnp.zeros((hidden_pad, n_pad), jnp.bfloat16).at[:hidden, :n_embd].set(
        w2.astype(jnp.bfloat16))
    b1p = jnp.zeros((1, hidden_pad), jnp.float32).at[0, :hidden].set(
        b1.astype(jnp.float32))
    b2p = jnp.zeros((1, n_pad), jnp.float32).at[0, :n_embd].set(
        b2.astype(jnp.float32))
    return dict(w1p=w1p, b1p=b1p, w2p=w2p, b2p=b2p,
                n_embd=n_embd, hidden=hidden, n_pad=n_pad, hidden_pad=hidden_pad)


def mlp_forward(x, params, *, tm=None, th=None):
    """x: [B, T, n_embd]; params: output of prepare_mlp_params."""
    n_embd = params["n_embd"]
    n_pad = params["n_pad"]
    hidden_pad = params["hidden_pad"]
    w1p, b1p, w2p, b2p = params["w1p"], params["b1p"], params["w2p"], params["b2p"]

    B, T, _ = x.shape
    assert x.shape[-1] == n_embd
    M = B * T
    out_dtype = x.dtype
    out_itemsize = jnp.dtype(out_dtype).itemsize

    tm_def, th_def, vmem_cap, n_cores = _chip_config()
    if tm is None:
        tm = tm_def
    if th is None:
        th = th_def

    # Hidden tile: multiple of 128 that divides the (pre-padded) hidden dim.
    th = _largest_divisor_tile(th, hidden_pad)

    # Row tile: clamp for small inputs, keep a multiple of 8 sublanes.
    tm = _round_up(max(8, min(tm, _round_up(M, 8))), 8)
    # On 2-TC chips make sure the "parallel" row axis has >= 2 tiles.
    if n_cores >= 2 and _round_up(M, tm) // tm < 2 and M > 8:
        tm = _round_up((M + 1) // 2, 8)

    # Shrink tiles until the working set fits ~75% of physical VMEM.
    budget = int(0.75 * vmem_cap)
    for _ in range(16):
        if _vmem_bytes(tm, th, n_pad, out_itemsize) <= budget:
            break
        if th > 128:
            th = _largest_divisor_tile(th - 128, hidden_pad)
        elif tm > 128:
            tm = max(128, _round_up(tm // 2, 128))
        else:
            break

    m_pad = _round_up(M, tm)
    grid = (m_pad // tm, hidden_pad // th)

    # Activation: skip the zero-pad copy entirely when already aligned.
    x2d = x.reshape(M, n_embd)
    if n_pad == n_embd and m_pad == M:
        x2d = x2d.astype(jnp.bfloat16)
    else:
        x2d = jnp.zeros((m_pad, n_pad), jnp.bfloat16).at[:M, :n_embd].set(
            x2d.astype(jnp.bfloat16))

    vmem_bytes = _vmem_bytes(tm, th, n_pad, out_itemsize)
    vmem_limit = int(min(max(2 * vmem_bytes, 32 << 20), int(0.85 * vmem_cap)))
    vmem_limit = int(min(max(vmem_limit, vmem_bytes + (2 << 20)),
                         int(0.9 * vmem_cap)))

    n_row_tiles = m_pad // tm
    cost = pl.CostEstimate(
        flops=4 * m_pad * n_pad * hidden_pad,       # two matmuls on padded dims
        transcendentals=0,
        bytes_accessed=int(
            m_pad * n_pad * 2                        # x read once
            + n_row_tiles * (w1p.size + w2p.size) * 2  # W streamed per row tile
            + n_row_tiles * (b1p.size + b2p.size) * 4
            + m_pad * n_pad * out_itemsize),         # output writeback
    )

    out2d = pl.pallas_call(
        _mlp_kernel,
        out_shape=jax.ShapeDtypeStruct((m_pad, n_pad), out_dtype),
        grid_spec=pltpu.PrefetchScalarGridSpec(
            num_scalar_prefetch=0,
            grid=grid,
            in_specs=[
                pl.BlockSpec((tm, n_pad), lambda i, k: (i, 0)),    # x tile
                pl.BlockSpec((n_pad, th), lambda i, k: (0, k)),    # W1[:, k]
                pl.BlockSpec((1, th), lambda i, k: (0, k)),        # b1[k]
                pl.BlockSpec((th, n_pad), lambda i, k: (k, 0)),    # W2[k, :]
                pl.BlockSpec((1, n_pad), lambda i, k: (0, 0)),     # b2
            ],
            out_specs=pl.BlockSpec((tm, n_pad), lambda i, k: (i, 0)),
            scratch_shapes=[pltpu.VMEM((tm, n_pad), jnp.float32)],
        ),
        compiler_params=pltpu.CompilerParams(
            dimension_semantics=("parallel", "arbitrary"),
            vmem_limit_bytes=vmem_limit,
        ),
        cost_estimate=cost,
    )(x2d, w1p, b1p, w2p, b2p)

    return out2d[:M, :n_embd].reshape(B, T, n_embd)


def init_params(key, n_embd, dtype=jnp.float32):
    """Deterministic init mimicking nn.Linear's uniform(-1/sqrt(fan_in), ...)."""
    hidden = 4 * n_embd
    k1, k2, k3, k4 = jax.random.split(key, 4)
    bound1 = 1.0 / jnp.sqrt(n_embd)
    bound2 = 1.0 / jnp.sqrt(hidden)
    # stored as (in, out) = torch weight transposed
    w1 = jax.random.uniform(k1, (n_embd, hidden), dtype, -bound1, bound1)
    b1 = jax.random.uniform(k2, (hidden,), dtype, -bound1, bound1)
    w2 = jax.random.uniform(k3, (hidden, n_embd), dtype, -bound2, bound2)
    b2 = jax.random.uniform(k4, (n_embd,), dtype, -bound2, bound2)
    return w1, b1, w2, b2


if __name__ == "__main__":
    key = jax.random.PRNGKey(0)
    n_embd = 32
    B, T = 2, 8

    kx, kp = jax.random.split(key)
    x = jax.random.normal(kx, (B, T, n_embd), jnp.float32)
    w1, b1, w2, b2 = init_params(kp, n_embd)

    # One-time weight preparation (pad + bf16 cast), then the forward call.
    params = prepare_mlp_params(w1, b1, w2, b2)
    out = mlp_forward(x, params)
    out = jax.block_until_ready(out)

    # Reference with matching numerics (bf16 matmul inputs, f32 accumulation,
    # eval-mode dropout == identity).
    xb = x.reshape(-1, n_embd).astype(jnp.bfloat16).astype(jnp.float32)
    w1b = w1.astype(jnp.bfloat16).astype(jnp.float32)
    w2b = w2.astype(jnp.bfloat16).astype(jnp.float32)
    h = jnp.maximum(xb @ w1b + b1, 0.0)
    h = h.astype(jnp.bfloat16).astype(jnp.float32)
    ref = (h @ w2b + b2).reshape(B, T, n_embd)
    assert jnp.allclose(out, ref, atol=2e-3, rtol=2e-3), "mismatch vs reference"

    # Loose sanity check against the full-precision f32 path.
    ref_f32 = (jnp.maximum(x.reshape(-1, n_embd) @ w1 + b1, 0.0) @ w2
               + b2).reshape(B, T, n_embd)
    assert jnp.allclose(out, ref_f32, atol=5e-2, rtol=5e-2), "f32 drift too large"

    print("KERNEL_OK")
</pallas_src>

<mosaic_0001>
module attributes {stable_mosaic.version = 11 : i64} {
  func.func @_mlp_kernel(%arg0: i32, %arg1: i32, %arg2: memref<8x128xbf16, #tpu.memory_space<vmem>>, %arg3: memref<128x128xbf16, #tpu.memory_space<vmem>>, %arg4: memref<1x128xf32, #tpu.memory_space<vmem>>, %arg5: memref<128x128xbf16, #tpu.memory_space<vmem>>, %arg6: memref<1x128xf32, #tpu.memory_space<vmem>>, %arg7: memref<8x128xf32, #tpu.memory_space<vmem>>, %arg8: memref<8x128xf32, #tpu.memory_space<vmem>>) attributes {dimension_semantics = [#tpu.dimension_semantics<parallel>, #tpu.dimension_semantics<arbitrary>], iteration_bounds = array<i64: 2, 1>, scalar_prefetch = 0 : i64, scratch_operands = 1 : i64, tpu.core_type = #tpu.core_type<tc>, window_params = [{transform_indices = @transform_0, window_bounds = array<i64: 8, 128>}, {transform_indices = @transform_1, window_bounds = array<i64: 128, 128>}, {transform_indices = @transform_2, window_bounds = array<i64: 1, 128>}, {transform_indices = @transform_3, window_bounds = array<i64: 128, 128>}, {pipeline_mode = #tpu.pipeline_mode<synchronous>, transform_indices = @transform_4, window_bounds = array<i64: 1, 128>}, {transform_indices = @transform_5, window_bounds = array<i64: 8, 128>}]} {
    %c0_i32 = arith.constant 0 : i32
    %0 = arith.cmpi eq, %arg1, %c0_i32 : i32
    %1 = arith.extui %0 : i1 to i32
    %c0_i32_0 = arith.constant 0 : i32
    %2 = arith.cmpi ne, %1, %c0_i32_0 : i32
    scf.if %2 {
      %cst_16 = arith.constant 0.000000e+00 : f32
      %20 = vector.broadcast %cst_16 : f32 to vector<8x128xf32>
      %c0_17 = arith.constant 0 : index
      %c0_18 = arith.constant 0 : index
      %21 = vector.load %arg8[%c0_17, %c0_18] : memref<8x128xf32, #tpu.memory_space<vmem>>, vector<8x128xf32>
      tpu.vector_store %arg8[%c0_17, %c0_18], %20 {strides = array<i32>} : memref<8x128xf32, #tpu.memory_space<vmem>>, vector<8x128xf32>,
    } else {
    }
    %c0 = arith.constant 0 : index
    %c0_1 = arith.constant 0 : index
    %3 = vector.load %arg2[%c0, %c0_1] : memref<8x128xbf16, #tpu.memory_space<vmem>>, vector<8x128xbf16>
    %c0_2 = arith.constant 0 : index
    %c0_3 = arith.constant 0 : index
    %4 = vector.load %arg3[%c0_2, %c0_3] : memref<128x128xbf16, #tpu.memory_space<vmem>>, vector<128x128xbf16>
    %cst = arith.constant dense<0.000000e+00> : vector<8x128xf32>
    %5 = tpu.matmul %3, %4, %cst {dimension_numbers = #tpu.dot_dimension_numbers<[1], [0], [0], [1], [0, 0, 1, 1], [], []>} : vector<8x128xbf16>, vector<128x128xbf16>, vector<8x128xf32> -> vector<8x128xf32>
    %c0_4 = arith.constant 0 : index
    %c0_5 = arith.constant 0 : index
    %6 = vector.load %arg4[%c0_4, %c0_5] : memref<1x128xf32, #tpu.memory_space<vmem>>, vector<1x128xf32>
    %7 = vector.broadcast %6 : vector<1x128xf32> to vector<8x128xf32>
    %8 = arith.addf %5, %7 : vector<8x128xf32>
    %cst_6 = arith.constant 0.000000e+00 : f32
    %9 = vector.broadcast %cst_6 : f32 to vector<8x128xf32>
    %10 = arith.maximumf %8, %9 : vector<8x128xf32>
    %11 = arith.truncf %10 : vector<8x128xf32> to vector<8x128xbf16>
    %c0_7 = arith.constant 0 : index
    %c0_8 = arith.constant 0 : index
    %12 = vector.load %arg8[%c0_7, %c0_8] : memref<8x128xf32, #tpu.memory_space<vmem>>, vector<8x128xf32>
    %c0_9 = arith.constant 0 : index
    %c0_10 = arith.constant 0 : index
    %13 = vector.load %arg5[%c0_9, %c0_10] : memref<128x128xbf16, #tpu.memory_space<vmem>>, vector<128x128xbf16>
    %cst_11 = arith.constant dense<0.000000e+00> : vector<8x128xf32>
    %14 = tpu.matmul %11, %13, %cst_11 {dimension_numbers = #tpu.dot_dimension_numbers<[1], [0], [0], [1], [0, 0, 1, 1], [], []>} : vector<8x128xbf16>, vector<128x128xbf16>, vector<8x128xf32> -> vector<8x128xf32>
    %15 = arith.addf %12, %14 : vector<8x128xf32>
    %c0_12 = arith.constant 0 : index
    %c0_13 = arith.constant 0 : index
    %16 = vector.load %arg8[%c0_12, %c0_13] : memref<8x128xf32, #tpu.memory_space<vmem>>, vector<8x128xf32>
    tpu.vector_store %arg8[%c0_12, %c0_13], %15 {strides = array<i32>} : memref<8x128xf32, #tpu.memory_space<vmem>>, vector<8x128xf32>,
    %c0_i32_14 = arith.constant 0 : i32
    %17 = arith.cmpi eq, %arg1, %c0_i32_14 : i32
    %18 = arith.extui %17 : i1 to i32
    %c0_i32_15 = arith.constant 0 : i32
    %19 = arith.cmpi ne, %18, %c0_i32_15 : i32
    scf.if %19 {
      %c0_16 = arith.constant 0 : index
      %c0_17 = arith.constant 0 : index
      %20 = vector.load %arg8[%c0_16, %c0_17] : memref<8x128xf32, #tpu.memory_space<vmem>>, vector<8x128xf32>
      %c0_18 = arith.constant 0 : index
      %c0_19 = arith.constant 0 : index
      %21 = vector.load %arg6[%c0_18, %c0_19] : memref<1x128xf32, #tpu.memory_space<vmem>>, vector<1x128xf32>
      %22 = vector.broadcast %21 : vector<1x128xf32> to vector<8x128xf32>
      %23 = arith.addf %20, %22 : vector<8x128xf32>
      %c0_20 = arith.constant 0 : index
      %c0_21 = arith.constant 0 : index
      %24 = vector.load %arg7[%c0_20, %c0_21] : memref<8x128xf32, #tpu.memory_space<vmem>>, vector<8x128xf32>
      tpu.vector_store %arg7[%c0_20, %c0_21], %23 {strides = array<i32>} : memref<8x128xf32, #tpu.memory_space<vmem>>, vector<8x128xf32>,
    } else {
    }
    return
  }
  func.func @transform_0(%arg0: i32, %arg1: i32) -> (i32, i32) {
    %c0_i32 = arith.constant 0 : i32
    %c0_i32_0 = arith.constant 0 : i32
    return %arg0, %c0_i32 : i32, i32
  }
  func.func @transform_1(%arg0: i32, %arg1: i32) -> (i32, i32) {
    %c0_i32 = arith.constant 0 : i32
    %c0_i32_0 = arith.constant 0 : i32
    return %c0_i32, %arg1 : i32, i32
  }
  func.func @transform_2(%arg0: i32, %arg1: i32) -> (i32, i32) {
    %c0_i32 = arith.constant 0 : i32
    %c0_i32_0 = arith.constant 0 : i32
    return %c0_i32, %arg1 : i32, i32
  }
  func.func @transform_3(%arg0: i32, %arg1: i32) -> (i32, i32) {
    %c0_i32 = arith.constant 0 : i32
    %c0_i32_0 = arith.constant 0 : i32
    return %arg1, %c0_i32 : i32, i32
  }
  func.func @transform_4(%arg0: i32, %arg1: i32) -> (i32, i32) {
    %c0_i32 = arith.constant 0 : i32
    %c0_i32_0 = arith.constant 0 : i32
    %c0_i32_1 = arith.constant 0 : i32
    return %c0_i32, %c0_i32_0 : i32, i32
  }
  func.func @transform_5(%arg0: i32, %arg1: i32) -> (i32, i32) {
    %c0_i32 = arith.constant 0 : i32
    %c0_i32_0 = arith.constant 0 : i32
    return %arg0, %c0_i32 : i32, i32
  }
}

</mosaic_0001>

<bundles_post_ra>
// kernel: tpu_custom_call.1
= control target key start
LH: loop header
LB: loop body
LE: loop exit
PB: predicated region body
PF: predicated region fallthrough
CT: control target
= control target key end

     0   :  { %10 = vsyncpa [#allocation4], 0  ;;  %s1347_s0 = inlined_call_operand.hbm [shape: bf16[16,128], index: 0, kind: input, shape index: {}]   ;;  %s1348_s1 = inlined_call_operand.hbm [shape: bf16[128,128], index: 1, kind: input, shape index: {}]   ;;  %s1349_s2 = inlined_call_operand.vmem [shape: f32[1,128], index: 2, kind: input, shape index: {}]   ;;  %s1350_s3 = inlined_call_operand.hbm [shape: bf16[128,128], index: 3, kind: input, shape index: {}]   ;;  %s1351_s4 = inlined_call_operand.vmem [shape: f32[1,128], index: 4, kind: input, shape index: {}]   ;;  %s1352_s5 = inlined_call_operand.hbm [shape: f32[16,128], index: 5, kind: output, shape index: {}]  }
   0x1   :  { %12 = vsyncpa [#allocation4 + $0x1], 0 }
   0x2   :  { %13 = vsyncpa [#allocation7], 0 }
   0x3   :  { %14 = vsyncpa [#allocation5], 0 }
   0x4   :  { %16 = vsyncpa [#allocation5 + $0x1], 0  ;;  %s1087_s18 = smov 0   ;;  %s1089_s19 = smov 0  }
   0x5   :  { %s1091_s20 = smov 0   ;;  %s1093_s21 = smov 0  }
   0x6   :  { %s1095_s22 = smov 0   ;;  %s1097_s23 = smov 0  }
   0x7 LB: > { %s678_s24 = sadd.s32 4294967295, %s1047_s23   ;;  %s679_s25 = sadd.s32 4294967294, %s1047_s23   ;;  %s1047_s23 = sphi %s1097_s23, %s22_s23   ;;  %s1043_s22 = sphi %s1095_s22, %s1374_s22   ;;  %s1039_s21 = sphi %s1093_s21, %s1373_s21   ;;  %s1035_s20 = sphi %s1091_s20, %s1372_s20   ;;  %s1031_s19 = sphi %s1089_s19, %s1371_s19   ;;  %s1027_s18 = sphi %s1087_s18, %s1370_s18  }
   0x8   : > { %p54_p0 = scmp.ne.s32.totalorder %s1031_s19, %s1027_s18  ;;  %p1121_p1 = scmp.eq.s32.totalorder %s678_s24, 0 }
   0x9   : > { %p1125_p2 = scmp.eq.s32.totalorder %s678_s24, 1  ;;  %p183_p3 = scmp.eq.s32.totalorder %s679_s25, 1 }
   0xa   : > { %s1357_s26 = scalar_select %p1121_p1, 1, 0 }
   0xb   : > { %p1131_p4 = por %p1121_p1, %p54_p0  ;;  %p680_p5 = scmp.ge.s32.totalorder %s1047_s23, 1 }
   0xc   : > { %p1136_p6 = por %p183_p3, %p54_p0  ;;  %p190_p7 = scmp.lt.s32.totalorder %s1047_s23, 3 }
   0xd   : > { %s1359_s28 = scalar_select %p1131_p4, 1, 0 }
   0xe   : > { %s1360_s29 = scalar_select %p1136_p6, 1, 0 }
   0xf   : > { %p1141_p8 = pnand %p680_p5, %p190_p7  ;;  %s1049_s6 = smov [#allocation6]  }
  0x10   : > { %s204_s7 = sshll.u32 %s1049_s6, 4  ;;  %s1050_s9 = smov [#allocation8]   ;;  %s1145_s7 = int_to_ptr.vmem [resolvable:$true] %s204_s7 }
  0x11   : > { %p784_p9 = pneg %p1141_p8  ;;  %s226_s10 = sshll.u32 %s1050_s9, 4  ;;  %s1156_s10 = int_to_ptr.vmem [resolvable:$true] %s226_s10 }
  0x12   : > { %s875_s13 = scalar_lea.hbm %s1348_s1, 1024 }
  0x13   : > { %p1152_p11 = pnand %p784_p9, %p1121_p1  ;;  %p876_p12 = scmp.ne.s32.totalorder %s1348_s1, %s875_s13 }
  0x14   : > { %p882_p5 = scmp.lt.u32.totalorder %s875_s13, %s1348_s1 }
  0x15   : > { %p877_p13 = pneg %p1152_p11 }
  0x17   : > { %p878_p0 = pnand %p877_p13, %p876_p12 }
  0x19   : > { %p879_p3 = pneg %p878_p0 }
  0x1b   : > { %p884_p7 = pnand %p882_p5, %p879_p3 }
  0x1d   : > { %887 = shalt.err (!%p884_p7)
}
  0x1e   : > { %s888_s24 = scalar_lea.vmem %s1145_s7, 1024  ;;  %p896_p1 = scmp.lt.s32.totalorder %s1145_s7, %s1145_s7 }
  0x1f   : > { %p889_p9 = scmp.ne.s32.totalorder %s1145_s7, %s888_s24  ;;  %p897_p12 = scmp.lt.s32.totalorder %s888_s24, %s888_s24 }
  0x21   : > { %p891_p10 = pnand %p889_p9, %p877_p13  ;;  %p898_p0 = por %p897_p12, %p896_p1 }
  0x23   : > { %p892_p6 = pneg %p891_p10 }
  0x25   : > { %p899_p4 = pnand %p898_p0, %p892_p6 }
  0x27   : > { %902 = shalt.err (!%p899_p4)
}
  0x28   : > { %s1051_s25 = smov 64   ;;  %s1052_s6 = smov 4  }
  0x29   : > { %787 = dma.hbm_to_vmem [thread:$0]  (!%p1152_p11), %s1348_s1, 1024, %s1145_s7, [#allocation7], %s1051_s25, %s1051_s25, %s1052_s6  }
  0x2a   : > { %s903_s14 = scalar_lea.hbm %s1350_s3, 1024 }
  0x2b   : > { %p904_p1 = scmp.ne.s32.totalorder %s1350_s3, %s903_s14  ;;  %p910_p10 = scmp.lt.u32.totalorder %s903_s14, %s1350_s3 }
  0x2d   : > { %p906_p4 = pnand %p904_p1, %p877_p13 }
  0x2f   : > { %p907_p6 = pneg %p906_p4 }
  0x31   : > { %p912_p3 = pnand %p910_p10, %p907_p6 }
  0x33   : > { %915 = shalt.err (!%p912_p3)
}
  0x34   : > { %s916_s7 = scalar_lea.vmem %s1156_s10, 1024  ;;  %p924_p12 = scmp.lt.s32.totalorder %s1156_s10, %s1156_s10 }
  0x35   : > { %p917_p5 = scmp.ne.s32.totalorder %s1156_s10, %s916_s7  ;;  %p925_p0 = scmp.lt.s32.totalorder %s916_s7, %s916_s7 }
  0x37   : > { %p919_p7 = pnand %p917_p5, %p877_p13  ;;  %p926_p1 = por %p925_p0, %p924_p12 }
  0x39   : > { %p920_p9 = pneg %p919_p7 }
  0x3b   : > { %p927_p4 = pnand %p926_p1, %p920_p9 }
  0x3d   : > { %930 = shalt.err (!%p927_p4)
}
  0x3e   : > { %790 = dma.hbm_to_vmem [thread:$0]  (!%p1152_p11), %s1350_s3, 1024, %s1156_s10, [#allocation7], %s1051_s25, %s1051_s25, %s1052_s6  }
  0x3f   : > { %s34_s12 = sadd.s32 1, %s1043_s22  ;;  %s41_s13 = sadd.s32 1, %s1035_s20 }
  0x40   : > { %p36_p13 = scmp.ge.s32.totalorder %s34_s12, 2  ;;  %p48_p6 = scmp.ne.s32.totalorder %s1035_s20, %s1031_s19 }
  0x41   : > { %p49_p10 = scmp.eq.s32.totalorder %s1047_s23, 0  ;;  %p801_p3 = scmp.lt.s32.totalorder %s1047_s23, 2 }
  0x42   : > { %s1376_s12 = smov (%p36_p13, %s34_s12), 0  ;;  %p1220_p7 = por %p1125_p2, %p48_p6 }
  0x43   : > { %p50_p5 = por %p49_p10, %p48_p6  ;;  %s38_s14 = ssub.s32 %s1043_s22, %s1376_s12 }
  0x44   : > { %s1363_s8 = scalar_select %p1220_p7, 1, 0 }
  0x45   : > { %s243_s15 = sand.u32 1, %s1035_s20   ;;  %p39_p9 = scmp.eq.s32.totalorder %s38_s14, 0 }
  0x46   : > { %s685_s10 = sshll.u32 %s243_s15, 2  ;;  %s686_s25 = sshll.u32 %s1043_s22, 6 }
  0x47   : > { %s1229_s6 = scalar_select %p39_p9, %s1035_s20, %s41_s13  }
  0x48   : > { %s1234_s24 = scalar_lea.hbm %s1347_s0, %s686_s25  ;;  %s247_s27 = scalar_lea.vmem [#allocation3], %s685_s10 }
  0x49   : > { %s254_s7 = sshll.u32 %s247_s27, 4  ;;  %p1238_p2 = pnand %p801_p3, %p50_p5  ;;  %s1242_s7 = int_to_ptr.vmem [resolvable:$true] %s254_s7 }
  0x4a   : > { %s244_s11 = scalar_lea.sflag [#allocation4], %s243_s15  ;;  %s931_s13 = scalar_lea.hbm %s1234_s24, 64 }
  0x4b   : > { %p932_p11 = scmp.ne.s32.totalorder %s1234_s24, %s931_s13  ;;  %p933_p12 = pneg %p1238_p2 }
  0x4c   : > { %s936_s25 = scalar_lea.hbm %s1347_s0, 128  ;;  %p937_p4 = scmp.lt.u32.totalorder %s1234_s24, %s1347_s0 }
  0x4d   : > { %p934_p0 = pnand %p933_p12, %p932_p11  ;;  %p938_p13 = scmp.lt.u32.totalorder %s936_s25, %s931_s13 }
  0x4e   : > { %p940_p10 = scmp.lt.u32.totalorder %s931_s13, %s1234_s24 }
  0x4f   : > { %p935_p1 = pneg %p934_p0  ;;  %p939_p6 = por %p938_p13, %p937_p4 }
  0x51   : > { %p941_p3 = por %p940_p10, %p939_p6 }
  0x53   : > { %p942_p5 = pnand %p941_p3, %p935_p1 }
  0x55   : > { %945 = shalt.err (!%p942_p5)
}
  0x56   : > { %s946_s15 = scalar_lea.vmem %s1242_s7, 64  ;;  %s1053_s27 = smov [#allocation3]  }
  0x57   : > { %p947_p9 = scmp.ne.s32.totalorder %s1242_s7, %s946_s15  ;;  %s951_s14 = sshll.u32 %s1053_s27, 4  ;;  %s952_s14 = int_to_ptr.vmem [resolvable:$false] %s951_s14 }
  0x58   : > { %s953_s10 = scalar_lea.vmem %s952_s14, 128  ;;  %p954_p7 = scmp.lt.s32.totalorder %s1242_s7, %s952_s14 }
  0x59   : > { %p949_p11 = pnand %p947_p9, %p933_p12  ;;  %p955_p4 = scmp.lt.s32.totalorder %s953_s10, %s946_s15 }
  0x5b   : > { %p950_p0 = pneg %p949_p11  ;;  %p956_p13 = por %p955_p4, %p954_p7 }
  0x5d   : > { %p957_p6 = pnand %p956_p13, %p950_p0 }
  0x5f   : > { %960 = shalt.err (!%p957_p6)
}
  0x60   : > { %794 = dma.hbm_to_vmem [thread:$0]  (!%p1238_p2), %s1234_s24, 64, %s1242_s7, %s244_s11  }
  0x61   : > { %263 = sbr.rel (%p1141_p8) target bundleno = 588 (0x24c), region = 40  ;;  %s1272_s13 = sand.u32 (!%p1141_p8), 1, %s1031_s19  }
  0x62   : > { %s688_s25 = sshll.u32 (!%p1141_p8), %s1272_s13, 2  ;;  %s266_s16 = scalar_lea.sflag (!%p1141_p8), [#allocation4], %s1272_s13 }
  0x63   : > { %s1276_s17 = scalar_lea.vmem (!%p1141_p8), [#allocation3], %s688_s25  ;;  %p1365_p7 = scmp.ne.s32.totalorder (!%p1141_p8), %s1359_s28, 0 }
  0x68   : > { %1014 = dma.done.wait (%p1365_p7), %s266_s16, 64  }
  0x69   : > { %1016 = vsyncadd (%p1365_p7), %s266_s16, 4294967232  ;;  %p1366_p2 = scmp.ne.s32.totalorder %s1357_s26, 0 }
  0x6b   : > { %1018 = dma.done.wait (%p1366_p2), [#allocation7], 2048  }
  0x6c   : > { %1020 = vsyncadd (%p1366_p2), [#allocation7], 4294965248  ;;  %v1054_v0 = vmov 0.0   ;;  %vm1055_vm0 = vmmov 0   ;;  %v859_v1 = vld [vmem:[#allocation6] sm:$0xff]   ;;  %v860_v2 = vld [vmem:[#allocation6 + $0x8] sm:$0xff]  }
  0x6d   : > { %732 = vmatprep.subr.bf16.mxu0 %v1054_v0  ;;  %748 = vmatprep.mubr.msk.bf16.mxu0 %vm1055_vm0, %v1054_v0  ;;  %v861_v3 = vld [vmem:[#allocation6 + $0x10] sm:$0xff]   ;;  %v867_v4 = vld [vmem:[#allocation8] sm:$0xff]   ;;  %v862_v5 = vld [vmem:[#allocation6 + $0x18] sm:$0xff]   ;;  %s691_s30 = sshll.u32 %s1272_s13, 3  ;;  %s711_s9 = sshll.u32 %s1039_s21, 7 }
  0x6e   : > { %752 = vmatprep.subr.bf16.mxu1 %v1054_v0  ;;  %768 = vmatprep.mubr.msk.bf16.mxu1 %vm1055_vm0, %v1054_v0  ;;  %v868_v6 = vld [vmem:[#allocation8 + $0x8] sm:$0xff]   ;;  %v863_v7 = vld [vmem:[#allocation6 + $0x20] sm:$0xff]   ;;  %v869_v8 = vld [vmem:[#allocation8 + $0x10] sm:$0xff]   ;;  %s306_s11 = scalar_lea.vmem [#allocation9], %s691_s30  ;;  %s1298_s10 = scalar_lea.hbm %s1352_s5, %s711_s9 }
  0x6f   : > { %733 = vmatpush3.bf16.msra.mxu0 %v859_v1  ;;  %753 = vmatpush3.bf16.msra.mxu1 %v867_v4  ;;  %v864_v9 = vld [vmem:[#allocation6 + $0x28] sm:$0xff]   ;;  %v870_v10 = vld [vmem:[#allocation8 + $0x18] sm:$0xff]   ;;  %v865_v11 = vld [vmem:[#allocation6 + $0x30] sm:$0xff]   ;;  %s565_s15 = sshll.u32 %s306_s11, 4  ;;  %s552_s25 = scalar_lea.sflag [#allocation5], %s1272_s13  ;;  %s1300_s15 = int_to_ptr.vmem [resolvable:$true] %s565_s15 }
  0x70   : > { %734 = vmatprep.subr.bf16.mxu0 %v1054_v0  ;;  %754 = vmatprep.subr.bf16.mxu1 %v1054_v0  ;;  %v871_v12 = vld [vmem:[#allocation8 + $0x20] sm:$0xff]   ;;  %v866_v13 = vld [vmem:[#allocation6 + $0x38] sm:$0xff]   ;;  %v872_v14 = vld [vmem:[#allocation8 + $0x28] sm:$0xff]   ;;  %s961_s21 = scalar_lea.vmem %s1300_s15, 128  ;;  %p1367_p12 = scmp.ne.s32.totalorder %s1363_s8, 0 }
  0x71   : > { %v317_v15 = vld [vmem:[%s1276_s17] sm:$0xf]  ;;  %v873_v16 = vld [vmem:[#allocation8 + $0x30] sm:$0xff]   ;;  %p962_p8 = scmp.ne.s32.totalorder %s1300_s15, %s961_s21  ;;  %s1056_s16 = smov [#allocation9]  }
  0x72   : > { %v874_v17 = vld [vmem:[#allocation8 + $0x38] sm:$0xff]   ;;  %s965_s17 = sshll.u32 %s1056_s16, 4  ;;  %s966_s17 = int_to_ptr.vmem [resolvable:$false] %s965_s17 }
  0x73   : > { %735 = vmatpush3.bf16.msra.mxu0 %v860_v2  ;;  %755 = vmatpush3.bf16.msra.mxu1 %v868_v6  ;;  %v692_v18 = vld [vmem:[%s1349_s2] ss:$0 sm:$0xff]  ;;  %p963_p1 = pnand %p962_p8, %p1367_p12  ;;  %s967_s26 = scalar_lea.vmem %s966_s17, 256 }
  0x74   : > { %736 = vmatprep.subr.bf16.mxu0 %v1054_v0  ;;  %756 = vmatprep.subr.bf16.mxu1 %v1054_v0  ;;  %v709_v26 = vld [vmem:[%s1351_s4] ss:$0 sm:$0xff]  ;;  %p968_p3 = scmp.lt.s32.totalorder %s1300_s15, %s966_s17  ;;  %p969_p5 = scmp.lt.s32.totalorder %s967_s26, %s961_s21 }
  0x75   : > { %p964_p10 = pneg %p963_p1 }
  0x76   : > { %p970_p9 = por %p969_p5, %p968_p3 }
  0x77   : > { %737 = vmatpush3.bf16.msra.mxu0 %v861_v3  ;;  %757 = vmatpush3.bf16.msra.mxu1 %v869_v8 }
  0x78   : > { %738 = vmatprep.subr.bf16.mxu0 %v1054_v0  ;;  %758 = vmatprep.subr.bf16.mxu1 %v1054_v0  ;;  %p971_p11 = pnand %p970_p9, %p964_p10 }
  0x7b   : > { %739 = vmatpush3.bf16.msra.mxu0 %v862_v5  ;;  %759 = vmatpush3.bf16.msra.mxu1 %v870_v10 }
  0x7c   : > { %740 = vmatprep.subr.bf16.mxu0 %v1054_v0  ;;  %760 = vmatprep.subr.bf16.mxu1 %v1054_v0 }
  0x7f   : > { %741 = vmatpush3.bf16.msra.mxu0 %v863_v7  ;;  %761 = vmatpush3.bf16.msra.mxu1 %v871_v12 }
  0x80   : > { %742 = vmatprep.subr.bf16.mxu0 %v1054_v0  ;;  %762 = vmatprep.subr.bf16.mxu1 %v1054_v0 }
  0x83   : > { %743 = vmatpush3.bf16.msra.mxu0 %v864_v9  ;;  %763 = vmatpush3.bf16.msra.mxu1 %v872_v14 }
  0x84   : > { %744 = vmatprep.subr.bf16.mxu0 %v1054_v0  ;;  %764 = vmatprep.subr.bf16.mxu1 %v1054_v0 }
  0x87   : > { %745 = vmatpush3.bf16.msra.mxu0 %v865_v11  ;;  %765 = vmatpush3.bf16.msra.mxu1 %v873_v16 }
  0x88   : > { %746 = vmatprep.subr.bf16.mxu0 %v1054_v0  ;;  %766 = vmatprep.subr.bf16.mxu1 %v1054_v0 }
  0x8b   : > { %747 = vmatpush3.bf16.msra.mxu0 %v866_v13  ;;  %767 = vmatpush3.bf16.msra.mxu1 %v874_v17 }
  0x8e   : > { %749 = vmatmul.mubr.bf16.vlgmr.msra.gmra.mrb[0].mxu0 %v317_v15 }
 0x161   : > { %v423_v19 = vpop.f32.mrb[0].mxu0 }
 0x162   : > { %v424_v20 = vadd.f32 %v692_v18, %v423_v19  ;;  %v750_v21 = vpop.f32.mrb[1].mxu0 }
 0x163   : > { %v426_v22 = vpop.f32.mrb[2].mxu0 }
 0x164   : > { %v429_v23 = vmax.f32 %v424_v20, 0.0  ;;  %v751_v24 = vpop.f32.mrb[3].mxu0 }
 0x166   : > { %v430_v25 = vpack.c.bf16 %v429_v23, %v429_v23 }
 0x168   : > { %769 = vmatmul.mubr.bf16.vlgmr.msra.gmra.mrb[0].mxu1 %v430_v25 }
 0x23b   : > { %v530_v27 = vpop.f32.mrb[0].mxu1 }
 0x23c   : > { %v549_v28 = vadd.f32 %v709_v26, %v530_v27  ;;  %v770_v29 = vpop.f32.mrb[1].mxu1 }
 0x23d   : > { %v533_v30 = vpop.f32.mrb[2].mxu1 }
 0x23e   : > { %550 = vst [vmem:[%s306_s11] sm:$0xff] %v549_v28  ;;  %v771_v31 = vpop.f32.mrb[3].mxu1 }
 0x23f   : > { %974 = shalt.err (!%p971_p11)
}
 0x240   : > { %s975_s13 = scalar_lea.hbm %s1298_s10, 128  ;;  %s979_s24 = scalar_lea.hbm %s1352_s5, 256 }
 0x241   : > { %p976_p0 = scmp.ne.s32.totalorder %s1298_s10, %s975_s13  ;;  %p980_p6 = scmp.lt.u32.totalorder %s1298_s10, %s1352_s5 }
 0x242   : > { %p981_p7 = scmp.lt.u32.totalorder %s979_s24, %s975_s13  ;;  %p983_p8 = scmp.lt.u32.totalorder %s975_s13, %s1298_s10 }
 0x243   : > { %p977_p4 = pnand %p976_p0, %p1367_p12 }
 0x244   : > { %p982_p2 = por %p981_p7, %p980_p6 }
 0x245   : > { %p978_p13 = pneg %p977_p4 }
 0x246   : > { %p984_p1 = por %p983_p8, %p982_p2 }
 0x248   : > { %p985_p10 = pnand %p984_p1, %p978_p13 }
 0x24a   : > { %988 = shalt.err (!%p985_p10)
}
 0x24b   : > { %782 = dma.vmem_to_hbm [thread:$0]  (%p1367_p12), %s1300_s15, 128, %s1298_s10, %s552_s25  }
 0x24c PF: > { %s577_s11 = sand.u32 1, %s1027_s18   ;;  %p1368_p3 = scmp.ne.s32.totalorder %s1360_s29, 0 }
 0x24d   : > { %p1369_p5 = scmp.ge.s32.totalorder %s1047_s23, 2  ;;  %s578_s27 = scalar_lea.sflag [#allocation5], %s577_s11 }
 0x24f   : > { %p796_p9 = pnand %p1369_p5, %p1368_p3 }
 0x251   : > { %1022 = dma.done.wait (!%p796_p9), %s578_s27, 128  }
 0x252   : > { %1024 = vsyncadd (!%p796_p9), %s578_s27, 4294967168  ;;  %s22_s23 = sadd.s32 1, %s1047_s23   ;;  %s1370_s18 = smov %s1031_s19 }
 0x253   : > { %p19_p11 = scmp.ge.s32.totalorder %s22_s23, 4   ;;  %s1371_s19 = smov %s1035_s20 }
 0x254   : > { %s1372_s20 = smov %s1229_s6  ;;  %s1373_s21 = smov %s1043_s22 }
 0x255   : > { %s1374_s22 = smov %s1376_s12  ;;  %21 = sbr.rel (!%p19_p11) target bundleno = 7 (0x7), region = 106 }
 0x25c   :  { %583 = vsyncpa [#allocation4], 1 }
 0x25d   :  { %585 = vsyncpa [#allocation4 + $0x1], 1 }
 0x25e   :  { %586 = vsyncpa [#allocation7], 1 }
 0x25f   :  { %587 = vsyncpa [#allocation5], 1 }
 0x260   :  { %589 = vsyncpa [#allocation5 + $0x1], 1 }

</bundles_post_ra>
